<compile_context>
chip_gen: v7x
topology: tpu7x:2x2x1
jax: 0.10.0
libtpu: 0.0.40
codegen_flags: <defaults>
</compile_context>

<pallas_src>
import numpy as np
import jax
import jax.numpy as jnp
from jax.experimental import pallas as pl
from jax.experimental.pallas import tpu as pltpu


def _parse_padding(padding):
    try:
        pad_l, pad_b, pad_r, pad_t = padding
    except Exception:  # matches the bare `except:` in the PyTorch module
        pad_l = pad_b = pad_r = pad_t = padding
    return pad_l, pad_b, pad_r, pad_t


def _axis_map(n_in, n_out, pad_lo, pad_hi):
    """Emulate the sequential narrow/copy algorithm along one axis.

    Returns m of length n_out where m[o] is the source index in the input
    (or -1 meaning "stays zero"), following the exact PyTorch copy order.
    """
    m = [-1] * n_out
    i0 = -pad_lo if pad_lo < 0 else 0
    i1 = n_in + pad_hi if pad_hi < 0 else n_in
    o0 = pad_lo if pad_lo > 0 else 0
    for k, src in enumerate(range(i0, i1)):
        m[o0 + k] = src
    for i in range(pad_lo):                      # leading mirror (top / left)
        m[pad_lo - i - 1] = m[pad_lo + i]
    for i in range(pad_hi):                      # trailing mirror (bottom / right)
        m[n_out - pad_hi + i] = m[n_out - pad_hi - i - 1]
    return m


def _col_plan(cmap):
    """(kind, src_start, out_start, length) runs covering every output column.

    'copy' runs read consecutive (stride +1) input columns; reversed mirror
    columns decompose into length-1 copies (pads are small).  'zero' runs are
    cells the sequential algorithm leaves at 0.
    """
    plan, n, i = [], len(cmap), 0
    while i < n:
        if cmap[i] < 0:
            j = i
            while j < n and cmap[j] < 0:
                j += 1
            plan.append(("zero", 0, i, j - i))
            i = j
        else:
            j = i + 1
            while j < n and cmap[j] == cmap[j - 1] + 1:
                j += 1
            plan.append(("copy", int(cmap[i]), i, j - i))
            i = j
    return plan


def _row_extra_plan(rmap, o0, L):
    """Plan for output rows outside the interior [o0, o0+L): mirror copies
    (per-row, source given as an *input* row index) and grouped zero runs."""
    extras, n, d = [], len(rmap), 0
    while d < n:
        if o0 <= d < o0 + L:
            d += 1
            continue
        if rmap[d] < 0:
            j = d
            while j < n and not (o0 <= j < o0 + L) and rmap[j] < 0:
                j += 1
            extras.append(("zero", 0, d, j - d))
            d = j
        else:
            extras.append(("copy", int(rmap[d]), d, 1))
            d += 1
    return extras


def _make_kernel(col_plan, row_extra, o0_r, i0_r, L_r):
    """Kernel over one channel block: x_ref (bnc, H, W) -> o_ref (bnc, Ho, Wo)."""

    def kernel(x_ref, o_ref):
        bnc = o_ref.shape[0]
        Wo = o_ref.shape[2]
        odt = o_ref.dtype

        # --- Pass 1: interior output rows, every output column, ref -> ref ---
        if L_r > 0:
            for kind, src, off, ln in col_plan:
                if kind == "copy":
                    o_ref[:, o0_r:o0_r + L_r, off:off + ln] = (
                        x_ref[:, i0_r:i0_r + L_r, src:src + ln].astype(odt))
                else:
                    o_ref[:, o0_r:o0_r + L_r, off:off + ln] = jnp.zeros(
                        (bnc, L_r, ln), odt)

        # --- Pass 2: mirrored / zero rows, full width, sourced from the now
        #     finished interior rows of the output block itself -------------
        for kind, src, off, ln in row_extra:
            if kind == "copy":
                s = o0_r + (src - i0_r)          # interior row holding input row `src`
                o_ref[:, off:off + ln, :] = o_ref[:, s:s + ln, :]
            else:
                o_ref[:, off:off + ln, :] = jnp.zeros((bnc, ln, Wo), odt)

    return kernel


def symmetric_pad2d(x, padding, out_dtype=jnp.float32):
    """x: (N, C, H, W). Returns (N, C, Ho, Wo) in `out_dtype` (default f32)."""
    assert x.ndim == 4, "only Dimension=4 implemented"
    N, C, H, W = x.shape
    pad_l, pad_b, pad_r, pad_t = _parse_padding(padding)
    Ho = H + pad_t + pad_b
    Wo = W + pad_l + pad_r
    assert Wo >= 1 and Ho >= 1, "input is too small"
    assert Wo >= 2 * pad_l and Wo >= 2 * pad_r and Ho >= 2 * pad_t and Ho >= 2 * pad_b

    # Compile-time copy plans (no tensors, no matmuls, no per-element maps in VMEM).
    row_map = _axis_map(H, Ho, pad_t, pad_b)
    col_map = _axis_map(W, Wo, pad_l, pad_r)
    i0_r = -pad_t if pad_t < 0 else 0
    i1_r = H + pad_b if pad_b < 0 else H
    o0_r = pad_t if pad_t > 0 else 0
    L_r = max(i1_r - i0_r, 0)                      # number of interior rows
    col_runs = _col_plan(col_map)
    row_extra = _row_extra_plan(row_map, o0_r, L_r)

    NC = N * C
    xr = x.reshape(NC, H, W)                       # free: merges leading dims only

    # --- generation-aware block budgeting --------------------------------
    in_isize = np.dtype(x.dtype).itemsize
    out_isize = np.dtype(out_dtype).itemsize

    def _ru(a, m):
        return ((a + m - 1) // m) * m

    sub_in = max(8, 32 // in_isize)                # sublane packing multiple
    sub_out = max(8, 32 // out_isize)
    in_plane = _ru(H, sub_in) * _ru(W, 128) * in_isize       # VMEM bytes / channel
    out_plane = _ru(Ho, sub_out) * _ru(Wo, 128) * out_isize
    per_c = in_plane + out_plane

    try:
        vmem_cap = int(pltpu.get_tpu_info().vmem_capacity_bytes)
    except Exception:
        vmem_cap = 64 * 1024 * 1024                # conservative: v7x physical VMEM

    vmem_limit = min(vmem_cap * 7 // 10, 96 * 1024 * 1024)
    pair_budget = vmem_limit // 3                  # in+out pair; x2 buffers + headroom

    bnc = max(1, min(NC, pair_budget // per_c))
    if NC >= 2:
        # >= 2 grid steps: both v7x TensorCores get work, pipeline has overlap.
        bnc = min(bnc, pl.cdiv(NC, 2))
    if per_c > pair_budget:
        # TODO(synk): tile H (output-row blocks + scalar-prefetched input row
        # windows) for single planes that exceed VMEM even at one channel/block.
        vmem_limit = int(min(max(vmem_limit, 2 * per_c + (2 << 20)),
                             vmem_cap * 9 // 10))
    grid_nc = pl.cdiv(NC, bnc)                     # ragged last block: Pallas masks it

    bytes_accessed = NC * (H * W * in_isize + Ho * Wo * out_isize)

    out = pl.pallas_call(
        _make_kernel(col_runs, row_extra, o0_r, i0_r, L_r),
        out_shape=jax.ShapeDtypeStruct((NC, Ho, Wo), out_dtype),
        grid=(grid_nc,),
        in_specs=[pl.BlockSpec((bnc, H, W), lambda i: (i, 0, 0))],
        out_specs=pl.BlockSpec((bnc, Ho, Wo), lambda i: (i, 0, 0)),
        compiler_params=pltpu.CompilerParams(
            dimension_semantics=("parallel",),
            vmem_limit_bytes=int(vmem_limit)),
        cost_estimate=pl.CostEstimate(
            flops=0, transcendentals=0, bytes_accessed=bytes_accessed),
    )(xr)

    return out.reshape(N, C, Ho, Wo)               # free: splits leading dim only


if __name__ == "__main__":
    key = jax.random.PRNGKey(0)
    N, C, H, W = 2, 4, 16, 16
    x = jax.random.normal(key, (N, C, H, W), dtype=jnp.float32)

    padding = (2, 1, 3, 2)  # (pad_l, pad_b, pad_r, pad_t) -- PyTorch module order
    out = symmetric_pad2d(x, padding)
    out = jax.block_until_ready(out)

    # Reference: for non-negative pads this equals numpy 'symmetric' padding.
    pad_l, pad_b, pad_r, pad_t = padding
    ref = np.pad(np.asarray(x), ((0, 0), (0, 0), (pad_t, pad_b), (pad_l, pad_r)),
                 mode="symmetric").astype(np.float32)
    assert out.shape == ref.shape, (out.shape, ref.shape)
    assert out.dtype == jnp.float32
    np.testing.assert_allclose(np.asarray(out), ref, rtol=0, atol=0)

    print("KERNEL_OK")
</pallas_src>

<mosaic_0001>
module attributes {stable_mosaic.version = 11 : i64} {
  func.func @kernel(%arg0: i32, %arg1: memref<4x16x16xf32, #tpu.memory_space<vmem>>, %arg2: memref<4x19x21xf32, #tpu.memory_space<vmem>>) attributes {dimension_semantics = [#tpu.dimension_semantics<parallel>], iteration_bounds = array<i64: 2>, scalar_prefetch = 0 : i64, scratch_operands = 0 : i64, tpu.core_type = #tpu.core_type<tc>, window_params = [{transform_indices = @transform_0, window_bounds = array<i64: 4, 16, 16>}, {transform_indices = @transform_1, window_bounds = array<i64: 4, 19, 21>}]} {
    %c0 = arith.constant 0 : index
    %c0_0 = arith.constant 0 : index
    %c1 = arith.constant 1 : index
    %0 = vector.load %arg1[%c0, %c0_0, %c1] : memref<4x16x16xf32, #tpu.memory_space<vmem>>, vector<4x16x1xf32>
    %c0_1 = arith.constant 0 : index
    %c2 = arith.constant 2 : index
    %c0_2 = arith.constant 0 : index
    %1 = vector.load %arg2[%c0_1, %c2, %c0_2] : memref<4x19x21xf32, #tpu.memory_space<vmem>>, vector<4x16x1xf32>
    tpu.vector_store %arg2[%c0_1, %c2, %c0_2], %0 {strides = array<i32>} : memref<4x19x21xf32, #tpu.memory_space<vmem>>, vector<4x16x1xf32>,
    %c0_3 = arith.constant 0 : index
    %c0_4 = arith.constant 0 : index
    %c0_5 = arith.constant 0 : index
    %2 = vector.load %arg1[%c0_3, %c0_4, %c0_5] : memref<4x16x16xf32, #tpu.memory_space<vmem>>, vector<4x16x1xf32>
    %c0_6 = arith.constant 0 : index
    %c2_7 = arith.constant 2 : index
    %c1_8 = arith.constant 1 : index
    %3 = vector.load %arg2[%c0_6, %c2_7, %c1_8] : memref<4x19x21xf32, #tpu.memory_space<vmem>>, vector<4x16x1xf32>
    tpu.vector_store %arg2[%c0_6, %c2_7, %c1_8], %2 {strides = array<i32>} : memref<4x19x21xf32, #tpu.memory_space<vmem>>, vector<4x16x1xf32>,
    %c0_9 = arith.constant 0 : index
    %c0_10 = arith.constant 0 : index
    %c0_11 = arith.constant 0 : index
    %4 = vector.load %arg1[%c0_9, %c0_10, %c0_11] : memref<4x16x16xf32, #tpu.memory_space<vmem>>, vector<4x16x16xf32>
    %c0_12 = arith.constant 0 : index
    %c2_13 = arith.constant 2 : index
    %c2_14 = arith.constant 2 : index
    %5 = vector.load %arg2[%c0_12, %c2_13, %c2_14] : memref<4x19x21xf32, #tpu.memory_space<vmem>>, vector<4x16x16xf32>
    tpu.vector_store %arg2[%c0_12, %c2_13, %c2_14], %4 {strides = array<i32>} : memref<4x19x21xf32, #tpu.memory_space<vmem>>, vector<4x16x16xf32>,
    %c0_15 = arith.constant 0 : index
    %c0_16 = arith.constant 0 : index
    %c15 = arith.constant 15 : index
    %6 = vector.load %arg1[%c0_15, %c0_16, %c15] : memref<4x16x16xf32, #tpu.memory_space<vmem>>, vector<4x16x1xf32>
    %c0_17 = arith.constant 0 : index
    %c2_18 = arith.constant 2 : index
    %c18 = arith.constant 18 : index
    %7 = vector.load %arg2[%c0_17, %c2_18, %c18] : memref<4x19x21xf32, #tpu.memory_space<vmem>>, vector<4x16x1xf32>
    tpu.vector_store %arg2[%c0_17, %c2_18, %c18], %6 {strides = array<i32>} : memref<4x19x21xf32, #tpu.memory_space<vmem>>, vector<4x16x1xf32>,
    %c0_19 = arith.constant 0 : index
    %c0_20 = arith.constant 0 : index
    %c14 = arith.constant 14 : index
    %8 = vector.load %arg1[%c0_19, %c0_20, %c14] : memref<4x16x16xf32, #tpu.memory_space<vmem>>, vector<4x16x1xf32>
    %c0_21 = arith.constant 0 : index
    %c2_22 = arith.constant 2 : index
    %c19 = arith.constant 19 : index
    %9 = vector.load %arg2[%c0_21, %c2_22, %c19] : memref<4x19x21xf32, #tpu.memory_space<vmem>>, vector<4x16x1xf32>
    tpu.vector_store %arg2[%c0_21, %c2_22, %c19], %8 {strides = array<i32>} : memref<4x19x21xf32, #tpu.memory_space<vmem>>, vector<4x16x1xf32>,
    %c0_23 = arith.constant 0 : index
    %c0_24 = arith.constant 0 : index
    %c13 = arith.constant 13 : index
    %10 = vector.load %arg1[%c0_23, %c0_24, %c13] : memref<4x16x16xf32, #tpu.memory_space<vmem>>, vector<4x16x1xf32>
    %c0_25 = arith.constant 0 : index
    %c2_26 = arith.constant 2 : index
    %c20 = arith.constant 20 : index
    %11 = vector.load %arg2[%c0_25, %c2_26, %c20] : memref<4x19x21xf32, #tpu.memory_space<vmem>>, vector<4x16x1xf32>
    tpu.vector_store %arg2[%c0_25, %c2_26, %c20], %10 {strides = array<i32>} : memref<4x19x21xf32, #tpu.memory_space<vmem>>, vector<4x16x1xf32>,
    %c0_27 = arith.constant 0 : index
    %c3 = arith.constant 3 : index
    %c0_28 = arith.constant 0 : index
    %12 = vector.load %arg2[%c0_27, %c3, %c0_28] : memref<4x19x21xf32, #tpu.memory_space<vmem>>, vector<4x1x21xf32>
    %c0_29 = arith.constant 0 : index
    %c0_30 = arith.constant 0 : index
    %c0_31 = arith.constant 0 : index
    %13 = vector.load %arg2[%c0_29, %c0_30, %c0_31] : memref<4x19x21xf32, #tpu.memory_space<vmem>>, vector<4x1x21xf32>
    tpu.vector_store %arg2[%c0_29, %c0_30, %c0_31], %12 {strides = array<i32>} : memref<4x19x21xf32, #tpu.memory_space<vmem>>, vector<4x1x21xf32>,
    %c0_32 = arith.constant 0 : index
    %c2_33 = arith.constant 2 : index
    %c0_34 = arith.constant 0 : index
    %14 = vector.load %arg2[%c0_32, %c2_33, %c0_34] : memref<4x19x21xf32, #tpu.memory_space<vmem>>, vector<4x1x21xf32>
    %c0_35 = arith.constant 0 : index
    %c1_36 = arith.constant 1 : index
    %c0_37 = arith.constant 0 : index
    %15 = vector.load %arg2[%c0_35, %c1_36, %c0_37] : memref<4x19x21xf32, #tpu.memory_space<vmem>>, vector<4x1x21xf32>
    tpu.vector_store %arg2[%c0_35, %c1_36, %c0_37], %14 {strides = array<i32>} : memref<4x19x21xf32, #tpu.memory_space<vmem>>, vector<4x1x21xf32>,
    %c0_38 = arith.constant 0 : index
    %c17 = arith.constant 17 : index
    %c0_39 = arith.constant 0 : index
    %16 = vector.load %arg2[%c0_38, %c17, %c0_39] : memref<4x19x21xf32, #tpu.memory_space<vmem>>, vector<4x1x21xf32>
    %c0_40 = arith.constant 0 : index
    %c18_41 = arith.constant 18 : index
    %c0_42 = arith.constant 0 : index
    %17 = vector.load %arg2[%c0_40, %c18_41, %c0_42] : memref<4x19x21xf32, #tpu.memory_space<vmem>>, vector<4x1x21xf32>
    tpu.vector_store %arg2[%c0_40, %c18_41, %c0_42], %16 {strides = array<i32>} : memref<4x19x21xf32, #tpu.memory_space<vmem>>, vector<4x1x21xf32>,
    return
  }
  func.func @transform_0(%arg0: i32) -> (i32, i32, i32) {
    %c0_i32 = arith.constant 0 : i32
    %c0_i32_0 = arith.constant 0 : i32
    %c0_i32_1 = arith.constant 0 : i32
    return %arg0, %c0_i32, %c0_i32_0 : i32, i32, i32
  }
  func.func @transform_1(%arg0: i32) -> (i32, i32, i32) {
    %c0_i32 = arith.constant 0 : i32
    %c0_i32_0 = arith.constant 0 : i32
    %c0_i32_1 = arith.constant 0 : i32
    return %arg0, %c0_i32, %c0_i32_0 : i32, i32, i32
  }
}

</mosaic_0001>

<bundles_post_ra>
// kernel: tpu_custom_call.1
= control target key start
LH: loop header
LB: loop body
LE: loop exit
PB: predicated region body
PF: predicated region fallthrough
CT: control target
= control target key end

     0   :  { %6 = vsyncpa [#allocation3], 0  ;;  %s920_s0 = inlined_call_operand.hbm [shape: f32[8,16,16], index: 0, kind: input, shape index: {}]   ;;  %s921_s1 = inlined_call_operand.vmem [shape: f32[8,19,21], index: 1, kind: output, shape index: {}]  }
   0x1   :  { %8 = vsyncpa [#allocation3 + $0x1], 0  ;;  %s679_s6 = smov 0   ;;  %s681_s7 = smov 0  }
   0x2   :  { %s683_s8 = smov 0   ;;  %s685_s9 = smov 0  }
   0x3 LB: > { %s530_s10 = sadd.s32 4294967295, %s658_s9   ;;  %s699_s11 = sadd.s32 1, %s658_s9   ;;  %s658_s9 = sphi %s685_s9, %s928_s9   ;;  %s654_s8 = sphi %s683_s8, %s927_s8   ;;  %s650_s7 = sphi %s681_s7, %s926_s7   ;;  %s646_s6 = sphi %s679_s6, %s925_s6  }
   0x4   : > { %s18_s12 = ssub.s32 %s658_s9, %s699_s11  ;;  %s21_s13 = sadd.s32 1, %s654_s8 }
   0x5   : > { %p19_p0 = scmp.eq.s32.totalorder %s18_s12, 0  ;;  %p28_p1 = scmp.ne.s32.totalorder %s654_s8, %s650_s7 }
   0x6   : > { %p29_p2 = scmp.eq.s32.totalorder %s658_s9, 0  ;;  %p34_p3 = scmp.ne.s32.totalorder %s650_s7, %s646_s6 }
   0x7   : > { %s709_s14 = scalar_select %p19_p0, %s654_s8, %s21_s13  }
   0x8   : > { %p30_p4 = por %p29_p2, %p28_p1  ;;  %p35_p5 = scmp.eq.s32.totalorder %s530_s10, 0 }
   0x9   : > { %p553_p6 = scmp.lt.s32.totalorder %s658_s9, 2  ;;  %s84_s16 = sand.u32 1, %s654_s8  }
   0xa   : > { %p714_p7 = por %p35_p5, %p34_p3  ;;  %s534_s17 = sshll.u32 %s84_s16, 6 }
   0xb   : > { %s545_s18 = sshll.u32 %s658_s9, 10  ;;  %s88_s22 = scalar_lea.vmem [#allocation2], %s534_s17 }
   0xc   : > { %s723_s21 = scalar_lea.hbm %s920_s0, %s545_s18  ;;  %s96_s23 = sshll.u32 %s88_s22, 4  ;;  %s725_s23 = int_to_ptr.vmem [resolvable:$true] %s96_s23 }
   0xd   : > { %p727_p8 = pnand %p553_p6, %p30_p4  ;;  %s732_s25 = scalar_lea.sflag [#allocation3], %s84_s16 }
   0xe   : > { %s594_s26 = scalar_lea.hbm %s723_s21, 1024  ;;  %s599_s29 = scalar_lea.hbm %s920_s0, 2048 }
   0xf   : > { %p595_p10 = scmp.ne.s32.totalorder %s723_s21, %s594_s26  ;;  %p596_p11 = pneg %p727_p8 }
  0x10   : > { %p600_p0 = scmp.lt.u32.totalorder %s723_s21, %s920_s0  ;;  %p601_p1 = scmp.lt.u32.totalorder %s599_s29, %s594_s26 }
  0x11   : > { %p597_p12 = pnand %p596_p11, %p595_p10  ;;  %p603_p3 = scmp.lt.u32.totalorder %s594_s26, %s723_s21 }
  0x12   : > { %p602_p2 = por %p601_p1, %p600_p0 }
  0x13   : > { %p598_p13 = pneg %p597_p12 }
  0x14   : > { %p604_p4 = por %p603_p3, %p602_p2 }
  0x16   : > { %p605_p5 = pnand %p604_p4, %p598_p13 }
  0x18   : > { %608 = shalt.err (!%p605_p5)
}
  0x19   : > { %s609_s3 = scalar_lea.vmem %s725_s23, 1024  ;;  %s660_s4 = smov [#allocation2]  }
  0x1a   : > { %p610_p6 = scmp.ne.s32.totalorder %s725_s23, %s609_s3  ;;  %s614_s5 = sshll.u32 %s660_s4, 4  ;;  %s615_s5 = int_to_ptr.vmem [resolvable:$false] %s614_s5 }
  0x1b   : > { %s616_s6 = scalar_lea.vmem %s615_s5, 2048  ;;  %p617_p9 = scmp.lt.s32.totalorder %s725_s23, %s615_s5 }
  0x1c   : > { %p612_p10 = pnand %p610_p6, %p596_p11  ;;  %p618_p0 = scmp.lt.s32.totalorder %s616_s6, %s609_s3 }
  0x1e   : > { %p613_p12 = pneg %p612_p10  ;;  %p619_p1 = por %p618_p0, %p617_p9 }
  0x20   : > { %p620_p2 = pnand %p619_p1, %p613_p12 }
  0x22   : > { %623 = shalt.err (!%p620_p2)
}
  0x23   : > { %s661_s12 = smov 128   ;;  %s662_s13 = smov 8  }
  0x24   : > { %552 = dma.hbm_to_vmem [thread:$0]  (!%p727_p8), %s723_s21, 1024, %s725_s23, %s732_s25, %s661_s12, %s661_s12, %s662_s13  }
  0x25   : > { %p104_p11 = scmp.lt.s32.totalorder %s658_s9, 3  ;;  %p924_p13 = scmp.ge.s32.totalorder %s658_s9, 1 }
  0x27   : > { %p105_p3 = pnand %p924_p13, %p104_p11 }
  0x28   : > { %s110_s16 = sand.u32 (!%p105_p3), 1, %s650_s7  }
  0x29   : > { %108 = sbr.rel (%p105_p3) target bundleno = 267 (0x10b), region = 24  ;;  %s539_s17 = sshll.u32 (!%p105_p3), %s110_s16, 6 }
  0x2a   : > { %s111_s18 = scalar_lea.sflag (!%p105_p3), [#allocation3], %s110_s16  ;;  %s114_s19 = scalar_lea.vmem (!%p105_p3), [#allocation2], %s539_s17 }
  0x30   : > { %641 = dma.done.wait (%p714_p7), %s111_s18, 1024  }
  0x31   : > { %643 = vsyncadd (%p714_p7), %s111_s18, 4294966272  ;;  %v144_v0 = vld [vmem:[%s114_s19 + $0x10] sm:$0xff]  ;;  %v142_v1 = vld [vmem:[%s114_s19] sm:$0xff]  ;;  %s663_s20 = smov 127   ;;  %s664_s21 = smov 1   ;;  %vm182_vm0 = vcmask 7168  }
  0x32   : > { %162 = vrot.lane.b32.xlu1 %v144_v0, %s663_s20  ;;  %158 = vrot.lane.b32.xlu0 %v142_v1, %s663_s20  ;;  %v145_v2 = vld [vmem:[%s114_s19 + $0x18] sm:$0xff]  ;;  %v143_v3 = vld [vmem:[%s114_s19 + $0x8] sm:$0xff]  ;;  %s665_s15 = smov 2   ;;  %s666_s22 = smov 3   ;;  %vm231_vm1 = vcmask 15368   ;;  %vm280_vm2 = vcmask 146448  }
  0x33   : > { %v147_v4 = vld [vmem:[%s114_s19 + $0x28] sm:$0xff]  ;;  %v146_v5 = vld [vmem:[%s114_s19 + $0x20] sm:$0xff]  ;;  %v149_v6 = vld [vmem:[%s114_s19 + $0x38] sm:$0xff]  ;;  %s667_s23 = smov 5   ;;  %s668_s24 = smov 7   ;;  %vm329_vm3 = vcmask 154768  }
  0x34   : > { %v148_v7 = vld [vmem:[%s114_s19 + $0x30] sm:$0xff]  ;;  %s540_s25 = sshll.u32 %s530_s10, 2  ;;  %vm378_vm4 = vcmask 162968   ;;  %vm427_vm5 = vcmask 171168   ;;  %vm440_vm6 = vcmask 163840  }
  0x35   : > { %p136_p7 = scmp.lt.s32.totalorder %s540_s25, 7 }
  0x36   : > { %164 = vrot.lane.b32.xlu1 %v145_v2, %s663_s20  ;;  %160 = vrot.lane.b32.xlu0 %v143_v3, %s663_s20 }
  0x37   : > { %s930_s25 = smov (!%p136_p7, %s540_s25), 7 }
  0x38   : > { %s546_s26 = smul.u32 24, %s930_s25 }
  0x3a   : > { %168 = vrot.lane.b32.xlu1 %v147_v4, %s663_s20  ;;  %166 = vrot.lane.b32.xlu0 %v146_v5, %s663_s20  ;;  %s773_s29 = scalar_lea.vmem %s921_s1, %s546_s26 }
  0x3e   : > { %172 = vrot.lane.b32.xlu1 %v149_v6, %s663_s20  ;;  %170 = vrot.lane.b32.xlu0 %v148_v7, %s663_s20 }
  0x42   : > { %209 = vrot.lane.b32.xlu1 %v143_v3, %s664_s21  ;;  %207 = vrot.lane.b32.xlu0 %v142_v1, %s664_s21 }
  0x46   : > { %213 = vrot.lane.b32.xlu1 %v145_v2, %s664_s21  ;;  %211 = vrot.lane.b32.xlu0 %v144_v0, %s664_s21 }
  0x4a   : > { %217 = vrot.lane.b32.xlu1 %v147_v4, %s664_s21  ;;  %215 = vrot.lane.b32.xlu0 %v146_v5, %s664_s21 }
  0x4e   : > { %221 = vrot.lane.b32.xlu1 %v149_v6, %s664_s21  ;;  %219 = vrot.lane.b32.xlu0 %v148_v7, %s664_s21 }
  0x52   : > { %258 = vrot.lane.b32.xlu1 %v143_v3, %s665_s15  ;;  %256 = vrot.lane.b32.xlu0 %v142_v1, %s665_s15 }
  0x56   : > { %262 = vrot.lane.b32.xlu1 %v145_v2, %s665_s15  ;;  %260 = vrot.lane.b32.xlu0 %v144_v0, %s665_s15 }
  0x5a   : > { %266 = vrot.lane.b32.xlu1 %v147_v4, %s665_s15  ;;  %264 = vrot.lane.b32.xlu0 %v146_v5, %s665_s15 }
  0x5e   : > { %270 = vrot.lane.b32.xlu1 %v149_v6, %s665_s15  ;;  %268 = vrot.lane.b32.xlu0 %v148_v7, %s665_s15 }
  0x62   : > { %307 = vrot.lane.b32.xlu1 %v143_v3, %s666_s22  ;;  %305 = vrot.lane.b32.xlu0 %v142_v1, %s666_s22 }
  0x66   : > { %311 = vrot.lane.b32.xlu1 %v145_v2, %s666_s22  ;;  %309 = vrot.lane.b32.xlu0 %v144_v0, %s666_s22 }
  0x6a   : > { %315 = vrot.lane.b32.xlu1 %v147_v4, %s666_s22  ;;  %313 = vrot.lane.b32.xlu0 %v146_v5, %s666_s22 }
  0x6e   : > { %319 = vrot.lane.b32.xlu1 %v149_v6, %s666_s22  ;;  %317 = vrot.lane.b32.xlu0 %v148_v7, %s666_s22 }
  0x72   : > { %356 = vrot.lane.b32.xlu1 %v143_v3, %s667_s23  ;;  %354 = vrot.lane.b32.xlu0 %v142_v1, %s667_s23 }
  0x76   : > { %360 = vrot.lane.b32.xlu1 %v145_v2, %s667_s23  ;;  %358 = vrot.lane.b32.xlu0 %v144_v0, %s667_s23 }
  0x7a   : > { %364 = vrot.lane.b32.xlu1 %v147_v4, %s667_s23  ;;  %362 = vrot.lane.b32.xlu0 %v146_v5, %s667_s23 }
  0x7e   : > { %368 = vrot.lane.b32.xlu1 %v149_v6, %s667_s23  ;;  %366 = vrot.lane.b32.xlu0 %v148_v7, %s667_s23 }
  0x82   : > { %405 = vrot.lane.b32.xlu1 %v143_v3, %s668_s24  ;;  %403 = vrot.lane.b32.xlu0 %v142_v1, %s668_s24 }
  0x86   : > { %409 = vrot.lane.b32.xlu1 %v145_v2, %s668_s24  ;;  %407 = vrot.lane.b32.xlu0 %v144_v0, %s668_s24 }
  0x8a   : > { %413 = vrot.lane.b32.xlu1 %v147_v4, %s668_s24  ;;  %411 = vrot.lane.b32.xlu0 %v146_v5, %s668_s24 }
  0x8e   : > { %417 = vrot.lane.b32.xlu1 %v149_v6, %s668_s24  ;;  %415 = vrot.lane.b32.xlu0 %v148_v7, %s668_s24 }
  0xa4   : > { %v163_v8 = vpop.permute.xlu1 %162  ;;  %v159_v9 = vpop.permute.xlu0 %158 }
  0xa5   : > { %183 = vst.msk [vmem:[%s773_s29 + $0x2] sm:$0xff] %vm182_vm0, %v159_v9  ;;  %185 = vst.msk [vmem:[%s773_s29 + $0x1a] sm:$0xff] %vm182_vm0, %v163_v8 }
  0xa8   : > { %v165_v10 = vpop.permute.xlu1 %164  ;;  %v161_v11 = vpop.permute.xlu0 %160 }
  0xa9   : > { %184 = vst.msk [vmem:[%s773_s29 + $0xa] sm:$0xff] %vm182_vm0, %v161_v11  ;;  %186 = vst.msk [vmem:[%s773_s29 + $0x22] sm:$0xff] %vm182_vm0, %v165_v10 }
  0xac   : > { %v169_v12 = vpop.permute.xlu1 %168  ;;  %v167_v13 = vpop.permute.xlu0 %166 }
  0xad   : > { %188 = vst.msk [vmem:[%s773_s29 + $0x3a] sm:$0xff] %vm182_vm0, %v169_v12  ;;  %187 = vst.msk [vmem:[%s773_s29 + $0x32] sm:$0xff] %vm182_vm0, %v167_v13 }
  0xb0   : > { %v173_v14 = vpop.permute.xlu1 %172  ;;  %v171_v15 = vpop.permute.xlu0 %170 }
  0xb1   : > { %190 = vst.msk [vmem:[%s773_s29 + $0x52] sm:$0xff] %vm182_vm0, %v173_v14  ;;  %189 = vst.msk [vmem:[%s773_s29 + $0x4a] sm:$0xff] %vm182_vm0, %v171_v15 }
  0xb4   : > { %v210_v16 = vpop.permute.xlu1 %209  ;;  %v208_v17 = vpop.permute.xlu0 %207 }
  0xb5   : > { %233 = vst.msk [vmem:[%s773_s29 + $0xa] sm:$0xff] %vm231_vm1, %v210_v16  ;;  %232 = vst.msk [vmem:[%s773_s29 + $0x2] sm:$0xff] %vm231_vm1, %v208_v17 }
  0xb8   : > { %v214_v18 = vpop.permute.xlu1 %213  ;;  %v212_v19 = vpop.permute.xlu0 %211 }
  0xb9   : > { %235 = vst.msk [vmem:[%s773_s29 + $0x22] sm:$0xff] %vm231_vm1, %v214_v18  ;;  %234 = vst.msk [vmem:[%s773_s29 + $0x1a] sm:$0xff] %vm231_vm1, %v212_v19 }
  0xbc   : > { %v218_v20 = vpop.permute.xlu1 %217  ;;  %v216_v21 = vpop.permute.xlu0 %215 }
  0xbd   : > { %237 = vst.msk [vmem:[%s773_s29 + $0x3a] sm:$0xff] %vm231_vm1, %v218_v20  ;;  %236 = vst.msk [vmem:[%s773_s29 + $0x32] sm:$0xff] %vm231_vm1, %v216_v21 }
  0xc0   : > { %v222_v22 = vpop.permute.xlu1 %221  ;;  %v220_v23 = vpop.permute.xlu0 %219 }
  0xc1   : > { %239 = vst.msk [vmem:[%s773_s29 + $0x52] sm:$0xff] %vm231_vm1, %v222_v22  ;;  %238 = vst.msk [vmem:[%s773_s29 + $0x4a] sm:$0xff] %vm231_vm1, %v220_v23 }
  0xc4   : > { %v259_v24 = vpop.permute.xlu1 %258  ;;  %v257_v25 = vpop.permute.xlu0 %256 }
  0xc5   : > { %282 = vst.msk [vmem:[%s773_s29 + $0xa] sm:$0xff] %vm280_vm2, %v259_v24  ;;  %281 = vst.msk [vmem:[%s773_s29 + $0x2] sm:$0xff] %vm280_vm2, %v257_v25 }
  0xc8   : > { %v263_v26 = vpop.permute.xlu1 %262  ;;  %v261_v27 = vpop.permute.xlu0 %260 }
  0xc9   : > { %284 = vst.msk [vmem:[%s773_s29 + $0x22] sm:$0xff] %vm280_vm2, %v263_v26  ;;  %283 = vst.msk [vmem:[%s773_s29 + $0x1a] sm:$0xff] %vm280_vm2, %v261_v27 }
  0xcc   : > { %v267_v28 = vpop.permute.xlu1 %266  ;;  %v265_v29 = vpop.permute.xlu0 %264 }
  0xcd   : > { %286 = vst.msk [vmem:[%s773_s29 + $0x3a] sm:$0xff] %vm280_vm2, %v267_v28  ;;  %285 = vst.msk [vmem:[%s773_s29 + $0x32] sm:$0xff] %vm280_vm2, %v265_v29 }
  0xd0   : > { %v271_v30 = vpop.permute.xlu1 %270  ;;  %v269_v31 = vpop.permute.xlu0 %268 }
  0xd1   : > { %288 = vst.msk [vmem:[%s773_s29 + $0x52] sm:$0xff] %vm280_vm2, %v271_v30  ;;  %287 = vst.msk [vmem:[%s773_s29 + $0x4a] sm:$0xff] %vm280_vm2, %v269_v31 }
  0xd4   : > { %v308_v32 = vpop.permute.xlu1 %307  ;;  %v306_v33 = vpop.permute.xlu0 %305 }
  0xd5   : > { %331 = vst.msk [vmem:[%s773_s29 + $0xa] sm:$0xff] %vm329_vm3, %v308_v32  ;;  %330 = vst.msk [vmem:[%s773_s29 + $0x2] sm:$0xff] %vm329_vm3, %v306_v33 }
  0xd8   : > { %v312_v34 = vpop.permute.xlu1 %311  ;;  %v310_v35 = vpop.permute.xlu0 %309 }
  0xd9   : > { %333 = vst.msk [vmem:[%s773_s29 + $0x22] sm:$0xff] %vm329_vm3, %v312_v34  ;;  %332 = vst.msk [vmem:[%s773_s29 + $0x1a] sm:$0xff] %vm329_vm3, %v310_v35 }
  0xdc   : > { %v316_v36 = vpop.permute.xlu1 %315  ;;  %v314_v37 = vpop.permute.xlu0 %313 }
  0xdd   : > { %335 = vst.msk [vmem:[%s773_s29 + $0x3a] sm:$0xff] %vm329_vm3, %v316_v36  ;;  %334 = vst.msk [vmem:[%s773_s29 + $0x32] sm:$0xff] %vm329_vm3, %v314_v37 }
  0xe0   : > { %v320_v38 = vpop.permute.xlu1 %319  ;;  %v318_v39 = vpop.permute.xlu0 %317 }
  0xe1   : > { %337 = vst.msk [vmem:[%s773_s29 + $0x52] sm:$0xff] %vm329_vm3, %v320_v38  ;;  %336 = vst.msk [vmem:[%s773_s29 + $0x4a] sm:$0xff] %vm329_vm3, %v318_v39 }
  0xe4   : > { %v357_v40 = vpop.permute.xlu1 %356  ;;  %v355_v41 = vpop.permute.xlu0 %354 }
  0xe5   : > { %380 = vst.msk [vmem:[%s773_s29 + $0xa] sm:$0xff] %vm378_vm4, %v357_v40  ;;  %379 = vst.msk [vmem:[%s773_s29 + $0x2] sm:$0xff] %vm378_vm4, %v355_v41 }
  0xe8   : > { %v361_v42 = vpop.permute.xlu1 %360  ;;  %v359_v43 = vpop.permute.xlu0 %358 }
  0xe9   : > { %382 = vst.msk [vmem:[%s773_s29 + $0x22] sm:$0xff] %vm378_vm4, %v361_v42  ;;  %381 = vst.msk [vmem:[%s773_s29 + $0x1a] sm:$0xff] %vm378_vm4, %v359_v43 }
  0xec   : > { %v365_v44 = vpop.permute.xlu1 %364  ;;  %v363_v45 = vpop.permute.xlu0 %362 }
  0xed   : > { %384 = vst.msk [vmem:[%s773_s29 + $0x3a] sm:$0xff] %vm378_vm4, %v365_v44  ;;  %383 = vst.msk [vmem:[%s773_s29 + $0x32] sm:$0xff] %vm378_vm4, %v363_v45 }
  0xf0   : > { %v369_v46 = vpop.permute.xlu1 %368  ;;  %v367_v47 = vpop.permute.xlu0 %366 }
  0xf1   : > { %386 = vst.msk [vmem:[%s773_s29 + $0x52] sm:$0xff] %vm378_vm4, %v369_v46  ;;  %385 = vst.msk [vmem:[%s773_s29 + $0x4a] sm:$0xff] %vm378_vm4, %v367_v47 }
  0xf4   : > { %v406_v48 = vpop.permute.xlu1 %405  ;;  %v404_v49 = vpop.permute.xlu0 %403 }
  0xf5   : > { %429 = vst.msk [vmem:[%s773_s29 + $0xa] sm:$0xff] %vm427_vm5, %v406_v48  ;;  %428 = vst.msk [vmem:[%s773_s29 + $0x2] sm:$0xff] %vm427_vm5, %v404_v49 }
  0xf8   : > { %v410_v50 = vpop.permute.xlu1 %409  ;;  %v408_v51 = vpop.permute.xlu0 %407 }
  0xf9   : > { %431 = vst.msk [vmem:[%s773_s29 + $0x22] sm:$0xff] %vm427_vm5, %v410_v50  ;;  %430 = vst.msk [vmem:[%s773_s29 + $0x1a] sm:$0xff] %vm427_vm5, %v408_v51 }
  0xfc   : > { %v414_v52 = vpop.permute.xlu1 %413  ;;  %v412_v53 = vpop.permute.xlu0 %411  ;;  %v453_v56 = vld [vmem:[%s773_s29 + $0x11] sm:$0x1]  ;;  %v436_v58 = vld [vmem:[%s773_s29 + $0x3] sm:$0x1]  ;;  %v445_v61 = vld [vmem:[%s773_s29 + $0x2] sm:$0x1] }
  0xfd   : > { %433 = vst.msk [vmem:[%s773_s29 + $0x3a] sm:$0xff] %vm427_vm5, %v414_v52  ;;  %432 = vst.msk [vmem:[%s773_s29 + $0x32] sm:$0xff] %vm427_vm5, %v412_v53 }
  0xfe   : > { %457 = vst.msk [vmem:[%s773_s29 + $0x12] sm:$0x1] %vm440_vm6, %v453_v56  ;;  %441 = vst.msk [vmem:[%s773_s29] sm:$0x1] %vm440_vm6, %v436_v58 }
  0xff   : > { %449 = vst.msk [vmem:[%s773_s29 + $0x1] sm:$0x1] %vm440_vm6, %v445_v61 }
 0x100   : > { %v418_v54 = vpop.permute.xlu1 %417  ;;  %v416_v55 = vpop.permute.xlu0 %415  ;;  %v454_v57 = vld [vmem:[%s773_s29 + $0x29] sm:$0x1]  ;;  %v437_v59 = vld [vmem:[%s773_s29 + $0x1b] sm:$0x1]  ;;  %v446_v0 = vld [vmem:[%s773_s29 + $0x1a] sm:$0x1] }
 0x101   : > { %435 = vst.msk [vmem:[%s773_s29 + $0x52] sm:$0xff] %vm427_vm5, %v418_v54  ;;  %434 = vst.msk [vmem:[%s773_s29 + $0x4a] sm:$0xff] %vm427_vm5, %v416_v55 }
 0x102   : > { %458 = vst.msk [vmem:[%s773_s29 + $0x2a] sm:$0x1] %vm440_vm6, %v454_v57  ;;  %442 = vst.msk [vmem:[%s773_s29 + $0x18] sm:$0x1] %vm440_vm6, %v437_v59 }
 0x103   : > { %450 = vst.msk [vmem:[%s773_s29 + $0x19] sm:$0x1] %vm440_vm6, %v446_v0 }
 0x104   : > { %v455_v60 = vld [vmem:[%s773_s29 + $0x41] sm:$0x1]  ;;  %v438_v63 = vld [vmem:[%s773_s29 + $0x33] sm:$0x1]  ;;  %v447_v2 = vld [vmem:[%s773_s29 + $0x32] sm:$0x1] }
 0x105   : > { %459 = vst.msk [vmem:[%s773_s29 + $0x42] sm:$0x1] %vm440_vm6, %v455_v60  ;;  %443 = vst.msk [vmem:[%s773_s29 + $0x30] sm:$0x1] %vm440_vm6, %v438_v63 }
 0x106   : > { %451 = vst.msk [vmem:[%s773_s29 + $0x31] sm:$0x1] %vm440_vm6, %v447_v2 }
 0x108   : > { %v456_v62 = vld [vmem:[%s773_s29 + $0x59] sm:$0x1]  ;;  %v439_v1 = vld [vmem:[%s773_s29 + $0x4b] sm:$0x1]  ;;  %v448_v3 = vld [vmem:[%s773_s29 + $0x4a] sm:$0x1] }
 0x109   : > { %460 = vst.msk [vmem:[%s773_s29 + $0x5a] sm:$0x1] %vm440_vm6, %v456_v62  ;;  %444 = vst.msk [vmem:[%s773_s29 + $0x48] sm:$0x1] %vm440_vm6, %v439_v1 }
 0x10a   : > { %452 = vst.msk [vmem:[%s773_s29 + $0x49] sm:$0x1] %vm440_vm6, %v448_v3 }
 0x10b PF: > { %p11_p8 = scmp.ge.s32.totalorder %s699_s11, 4   ;;  %s925_s6 = smov %s650_s7 }
 0x10c   : > { %s926_s7 = smov %s654_s8  ;;  %s927_s8 = smov %s709_s14 }
 0x10d   : > { %s928_s9 = smov %s699_s11  ;;  %13 = sbr.rel (!%p11_p8) target bundleno = 3 (0x3), region = 64 }
 0x114   :  { %485 = vsyncpa [#allocation3], 1 }
 0x115   :  { %487 = vsyncpa [#allocation3 + $0x1], 1 }

</bundles_post_ra>
